<compile_context>
chip_gen: v5e
topology: v5e:2x2
jax: 0.10.0
libtpu: 0.0.40
codegen_flags: <defaults>
</compile_context>

<pallas_src>
import jax
import jax.numpy as jnp
from jax.experimental import pallas as pl
from jax.experimental.pallas import tpu as pltpu


def _pooler_kernel(x_ref, w_ref, b_ref, o_ref):
    # x_ref: (B_pad, H_in)   first-token activations, resident across the grid
    # w_ref: (TN, H_in)      weight tile, native PyTorch Linear layout
    # b_ref: (1, TN)         f32 bias tile
    # o_ref: (B_pad, TN)     output tile
    y = jax.lax.dot_general(
        x_ref[...], w_ref[...],
        dimension_numbers=(((1,), (1,)), ((), ())),   # x @ W^T on the MXU
        preferred_element_type=jnp.float32)
    y = y + b_ref[...].astype(jnp.float32)
    o_ref[...] = jnp.tanh(y).astype(o_ref.dtype)      # f32 epilogue, EUP tanh


def bert_pooler(hidden_states, weight, bias, *, compute_dtype=jnp.bfloat16):
    """hidden_states: (B, S, H); weight: (H_out, H_in) [PyTorch layout]; bias: (H_out,)."""
    B, S, H_in = hidden_states.shape
    H_out, H_in_w = weight.shape
    assert H_in_w == H_in

    out_dtype = hidden_states.dtype
    compute_dtype = jnp.dtype(compute_dtype)
    is_bf16 = compute_dtype == jnp.dtype(jnp.bfloat16)

    # Only the first-token slice is read and cast (tiny: B*H elements), never
    # the full (B, S, H) tensor.  In a real model the bf16 weight would be
    # cached at parameter-load time.
    x0 = hidden_states[:, 0, :].astype(compute_dtype)
    w = weight.astype(compute_dtype)
    b2 = bias.reshape(1, H_out).astype(jnp.float32)

    # Pad batch to a full sublane group -> unmasked vst + full MXU pushes.
    sublane = 16 if is_bf16 else 8
    B_pad = ((B + sublane - 1) // sublane) * sublane
    if B_pad != B:
        x0 = jnp.pad(x0, ((0, B_pad - B), (0, 0)))

    # Output-dim tile: lane-dense multiple of 128, or the full dim when small.
    tn_desired = 1024 if is_bf16 else 512
    TN = H_out if H_out <= tn_desired else tn_desired
    grid = (pl.cdiv(H_out, TN),)

    # VMEM budget from the double-buffered *tiles* (not the whole weight),
    # capped by the physical VMEM of the chip we are actually on.
    c_item = compute_dtype.itemsize
    o_item = jnp.dtype(out_dtype).itemsize
    step_bytes = (TN * H_in * c_item          # weight tile
                  + B_pad * H_in * c_item     # resident first-token block
                  + B_pad * TN * o_item       # output tile
                  + TN * 4)                   # f32 bias tile
    vmem_needed = 2 * step_bytes + (1 << 20)  # double-buffered + headroom
    try:
        vmem_cap = int(pltpu.get_tpu_info().vmem_capacity_bytes * 0.75)
    except Exception:  # pragma: no cover - conservative fallback (v7x-safe)
        vmem_cap = 48 * 1024 * 1024
    vmem_limit = int(min(max(vmem_needed, 16 * 1024 * 1024), vmem_cap))

    pooled_padded = pl.pallas_call(
        _pooler_kernel,
        out_shape=jax.ShapeDtypeStruct((B_pad, H_out), out_dtype),
        grid=grid,
        in_specs=[
            # x: constant index_map -> DMA'd once, resident across all j steps.
            pl.BlockSpec((B_pad, H_in), lambda j: (0, 0)),
            # Weight tile j along H_out (native (H_out, H_in) layout).
            # Default Buffered(2); sweep pl.Buffered(3) only if DMA stays exposed.
            pl.BlockSpec((TN, H_in), lambda j: (j, 0)),
            pl.BlockSpec((1, TN), lambda j: (0, j)),
        ],
        out_specs=pl.BlockSpec((B_pad, TN), lambda j: (0, j)),
        compiler_params=pltpu.CompilerParams(
            dimension_semantics=("parallel",),   # shards across v7x's 2 TCs
            vmem_limit_bytes=vmem_limit),
        cost_estimate=pl.CostEstimate(
            flops=2 * B_pad * H_in * H_out,
            transcendentals=B_pad * H_out,
            bytes_accessed=(H_out * H_in * c_item     # weight (dominant)
                            + B_pad * H_in * c_item   # activations
                            + B_pad * H_out * o_item  # output
                            + H_out * 4)),            # bias
    )(x0, w, b2)

    pooled = pooled_padded[:B]
    # Module returns hidden_states unchanged plus the pooled output.
    return hidden_states, pooled


def _reference(hidden_states, weight, bias):
    first = hidden_states[:, 0, :]
    return jnp.tanh(first @ weight.T + bias)


if __name__ == "__main__":
    B, S, H = 2, 8, 32
    key = jax.random.PRNGKey(0)
    k_h, k_w, k_b, _ = jax.random.split(key, 4)

    hidden_states = jax.random.normal(k_h, (B, S, H), dtype=jnp.float32)
    attention_mask = jnp.ones((B, S), dtype=jnp.float32)  # unused by forward
    weight = jax.random.normal(k_w, (H, H), dtype=jnp.float32) * 0.02
    bias = jax.random.normal(k_b, (H,), dtype=jnp.float32) * 0.02

    hs_out, pooled = bert_pooler(hidden_states, weight, bias)
    jax.block_until_ready(pooled)

    ref = _reference(hidden_states, weight, bias)
    assert hs_out.shape == (B, S, H)
    assert pooled.shape == (B, H)
    # bf16 inputs / f32 accumulation -> loosened tolerance vs the f32 reference.
    assert jnp.allclose(pooled, ref, atol=1e-2, rtol=1e-2), (
        float(jnp.max(jnp.abs(pooled - ref))))
    assert jnp.array_equal(hs_out, hidden_states)

    print("KERNEL_OK")
</pallas_src>

<mosaic_0001>
module attributes {stable_mosaic.version = 11 : i64} {
  func.func @_pooler_kernel(%arg0: i32, %arg1: memref<16x32xbf16, #tpu.memory_space<vmem>>, %arg2: memref<32x32xbf16, #tpu.memory_space<vmem>>, %arg3: memref<1x32xf32, #tpu.memory_space<vmem>>, %arg4: memref<16x32xf32, #tpu.memory_space<vmem>>) attributes {dimension_semantics = [#tpu.dimension_semantics<parallel>], iteration_bounds = array<i64: 1>, scalar_prefetch = 0 : i64, scratch_operands = 0 : i64, tpu.core_type = #tpu.core_type<tc>, window_params = [{pipeline_mode = #tpu.pipeline_mode<synchronous>, transform_indices = @transform_0, window_bounds = array<i64: 16, 32>}, {transform_indices = @transform_1, window_bounds = array<i64: 32, 32>}, {transform_indices = @transform_2, window_bounds = array<i64: 1, 32>}, {transform_indices = @transform_3, window_bounds = array<i64: 16, 32>}]} {
    %c0 = arith.constant 0 : index
    %c0_0 = arith.constant 0 : index
    %0 = vector.load %arg1[%c0, %c0_0] : memref<16x32xbf16, #tpu.memory_space<vmem>>, vector<16x32xbf16>
    %c0_1 = arith.constant 0 : index
    %c0_2 = arith.constant 0 : index
    %1 = vector.load %arg2[%c0_1, %c0_2] : memref<32x32xbf16, #tpu.memory_space<vmem>>, vector<32x32xbf16>
    %cst = arith.constant dense<0.000000e+00> : vector<16x32xf32>
    %2 = tpu.matmul %0, %1, %cst {dimension_numbers = #tpu.dot_dimension_numbers<[1], [1], [0], [0], [0, 0, 1, 0], [], []>} : vector<16x32xbf16>, vector<32x32xbf16>, vector<16x32xf32> -> vector<16x32xf32>
    %c0_3 = arith.constant 0 : index
    %c0_4 = arith.constant 0 : index
    %3 = vector.load %arg3[%c0_3, %c0_4] : memref<1x32xf32, #tpu.memory_space<vmem>>, vector<1x32xf32>
    %4 = vector.broadcast %3 : vector<1x32xf32> to vector<16x32xf32>
    %5 = arith.addf %2, %4 : vector<16x32xf32>
    %6 = math.tanh %5 : vector<16x32xf32>
    %c0_5 = arith.constant 0 : index
    %c0_6 = arith.constant 0 : index
    %7 = vector.load %arg4[%c0_5, %c0_6] : memref<16x32xf32, #tpu.memory_space<vmem>>, vector<16x32xf32>
    tpu.vector_store %arg4[%c0_5, %c0_6], %6 {strides = array<i32>} : memref<16x32xf32, #tpu.memory_space<vmem>>, vector<16x32xf32>,
    return
  }
  func.func @transform_0(%arg0: i32) -> (i32, i32) {
    %c0_i32 = arith.constant 0 : i32
    %c0_i32_0 = arith.constant 0 : i32
    %c0_i32_1 = arith.constant 0 : i32
    return %c0_i32, %c0_i32_0 : i32, i32
  }
  func.func @transform_1(%arg0: i32) -> (i32, i32) {
    %c0_i32 = arith.constant 0 : i32
    %c0_i32_0 = arith.constant 0 : i32
    return %arg0, %c0_i32 : i32, i32
  }
  func.func @transform_2(%arg0: i32) -> (i32, i32) {
    %c0_i32 = arith.constant 0 : i32
    %c0_i32_0 = arith.constant 0 : i32
    return %c0_i32, %arg0 : i32, i32
  }
  func.func @transform_3(%arg0: i32) -> (i32, i32) {
    %c0_i32 = arith.constant 0 : i32
    %c0_i32_0 = arith.constant 0 : i32
    return %c0_i32, %arg0 : i32, i32
  }
}

</mosaic_0001>

<bundles_post_ra>
// kernel: tpu_custom_call.1
= control target key start
LH: loop header
LB: loop body
LE: loop exit
PB: predicated region body
PF: predicated region fallthrough
CT: control target
= control target key end

     0   :  { %8 = vsyncpa [#allocation3], 0  ;;  %s271_s0 = inlined_call_operand.hbm [shape: bf16[16,32], index: 0, kind: input, shape index: {}]   ;;  %s272_s1 = inlined_call_operand.hbm [shape: bf16[32,32], index: 1, kind: input, shape index: {}]   ;;  %s273_s2 = inlined_call_operand.vmem [shape: f32[1,32], index: 2, kind: input, shape index: {}]   ;;  %s274_s3 = inlined_call_operand.hbm [shape: f32[16,32], index: 3, kind: output, shape index: {}]  }
   0x1   :  { %9 = vsyncpa [#allocation6], 0 }
   0x2   :  { %10 = vsyncpa [#allocation4], 0  ;;  %s15_s14 = sshll.u32 %s271_s0, 4  ;;  %s227_s15 = smov [#allocation2]   ;;  %s16_s14 = int_to_ptr.hbm [resolvable:$true] %s15_s14 }
   0x3   :  { %s17_s16 = sshll.u32 %s227_s15, 4  ;;  %s28_s19 = sshll.u32 %s272_s1, 4  ;;  %s18_s16 = int_to_ptr.vmem [resolvable:$true] %s17_s16  ;;  %s29_s19 = int_to_ptr.hbm [resolvable:$true] %s28_s19 }
   0x4   :  { %s228_s20 = smov 64   ;;  %s229_s21 = smov 4  }
   0x5   :  { %23 = dma.hbm_to_vmem [thread:$0]  %s16_s14, 128, %s18_s16, [#allocation3], %s228_s20, %s228_s20, %s229_s21  }
   0x6   :  { %s230_s22 = smov [#allocation5]  }
   0x7   :  { %s30_s23 = sshll.u32 %s230_s22, 4  ;;  %s31_s23 = int_to_ptr.vmem [resolvable:$true] %s30_s23 }
   0x8   :  { %36 = dma.hbm_to_vmem [thread:$0]  %s29_s19, 256, %s31_s23, [#allocation6], %s228_s20, %s228_s20, %s229_s21  }
   0x9   :  { %221 = dma.done.wait [#allocation3], 128  }
   0xa   :  { %222 = vsyncadd [#allocation3], 4294967168 }
   0xb   :  { %223 = dma.done.wait [#allocation6], 256  }
   0xc   :  { %224 = vsyncadd [#allocation6], 4294967040  ;;  %vm73_vm0 = vcmask 261120   ;;  %v136_v0 = vld [vmem:[#allocation5 + $0x8] sm:$0xff]  ;;  %v135_v2 = vld [vmem:[#allocation5] sm:$0xff]  ;;  %s231_s24 = smov [#allocation7]  }
   0xd   :  { %v81_v1 = vsel %vm73_vm0, %v136_v0, 0  ;;  %v78_v3 = vsel %vm73_vm0, %v135_v2, 0  ;;  %v134_v4 = vld [vmem:[#allocation2] sm:$0xff]  ;;  %s105_s25 = sshll.u32 %s231_s24, 4  ;;  %s107_s28 = sshll.u32 %s274_s3, 4  ;;  %s106_s25 = int_to_ptr.vmem [resolvable:$true] %s105_s25  ;;  %s108_s28 = int_to_ptr.hbm [resolvable:$true] %s107_s28 }
   0xe   :  { %89 = vmatpush.bf16.xpose.msra.mxu0 %v81_v1  ;;  %v144_v5 = vld [vmem:[%s273_s2] ss:$0 sm:$0xff]  ;;  %s232_s2 = smov 128   ;;  %s233_s29 = smov 8  }
  0x16   :  { %90 = vmatpush.bf16.xpose.msra.mxu0 %v78_v3 }
  0x1d   :  { %133 = vmatmul.msk.bf16.vlgmr.msra.gmra.mxu0 %vm73_vm0, %v134_v4 }
  0x9a   :  { %v92_v6 = vpop.f32.mrf.mxu0 }
  0x9b   :  { %v93_v7 = vadd.f32 %v144_v5, %v92_v6 }
  0x9d   :  { %145 = vtanh.f32 %v93_v7 }
  0xa2   :  { %v94_v8 = vpop.f32.mrf.mxu0 }
  0xa3   :  { %v146_v9 = vpop.eup %145  ;;  %v95_v10 = vadd.f32 %v144_v5, %v94_v8 }
  0xa4   :  { %99 = vst.msk [vmem:[#allocation7] sm:$0xff] %vm73_vm0, %v146_v9 }
  0xa5   :  { %147 = vtanh.f32 %v95_v10 }
  0xab   :  { %v148_v11 = vpop.eup %147 }
  0xac   :  { %100 = vst.msk [vmem:[#allocation7 + $0x8] sm:$0xff] %vm73_vm0, %v148_v11 }
  0xad   :  { %113 = dma.vmem_to_hbm [thread:$0]  %s106_s25, 256, %s108_s28, [#allocation4], %s232_s2, %s232_s2, %s233_s29  }
  0xae   :  { %225 = dma.done.wait [#allocation4], 256  }
  0xaf   :  { %226 = vsyncadd [#allocation4], 4294967040 }
  0xb0   :  { %118 = vsyncpa [#allocation3], 1 }
  0xb1   :  { %119 = vsyncpa [#allocation6], 1 }
  0xb2   :  { %120 = vsyncpa [#allocation4], 1 }

</bundles_post_ra>
